<compile_context>
chip_gen: v7x
topology: tpu7x:2x2x1
jax: 0.10.0
libtpu: 0.0.40
codegen_flags: <defaults>
</compile_context>

<pallas_src>
from functools import partial
import math

import jax
import jax.numpy as jnp
from jax.experimental import pallas as pl
from jax.experimental.pallas import tpu as pltpu

_LANES = 128


def _cdiv(a, b):
    return -(-a // b)


def _round_up(a, b):
    return _cdiv(a, b) * b


# ---------------------------------------------------------------------------
# Minimal o3 helpers for the (mul, l, parity) representation
# (mirrors e3nn_little.o3.simplify / o3.dim semantics).
# ---------------------------------------------------------------------------
def simplify(Rs):
    out = []
    for mul, l, p in Rs:
        if mul == 0:
            continue
        if out and out[-1][1] == l and out[-1][2] == p:
            out[-1] = (out[-1][0] + mul, l, p)
        else:
            out.append((mul, l, p))
    return tuple(out)


def rs_dim(Rs):
    return sum(mul * (2 * l + 1) for mul, l, _ in Rs)


def sortcut_plan(*Rs_outs):
    """Statically reproduce Sortcut.__init__ + the forward() index bookkeeping.

    Returns (Rs_in, Rs_outs, out_dims, copies) where copies[k] is a list of
    (i_out, i_in, d) slice-copy triples for output k.
    """
    Rs_outs = tuple(simplify(Rs) for Rs in Rs_outs)
    Rs_in = simplify(
        sorted((x for Rs in Rs_outs for x in Rs), key=lambda rs: (rs[1], rs[2]))
    )
    copies = [[] for _ in Rs_outs]
    i_in = 0
    for _, l_in, p_in in Rs_in:
        for k, Rs_out in enumerate(Rs_outs):
            i_out = 0
            for mul_out, l_out, p_out in Rs_out:
                d = mul_out * (2 * l_out + 1)
                if (l_in, p_in) == (l_out, p_out):
                    copies[k].append((i_out, i_in, d))
                    i_in += d
                i_out += d
    out_dims = tuple(rs_dim(Rs) for Rs in Rs_outs)
    assert i_in == rs_dim(Rs_in)
    return Rs_in, Rs_outs, out_dims, copies


def _packed_piece_plans(copies, out_dims, d_in, group):
    """Per-output ordered (input_offset, width) pieces in the G-packed layout.

    Packed layout: G logical rows per kernel row, i.e. the input block is
    (rows, G*d_in) and output k is (rows, G*out_dims[k]).  Adjacent pieces
    with contiguous input ranges are merged to reduce lane-shift work.
    """
    plans = []
    for dk, cps in zip(out_dims, copies):
        pieces = []
        for g in range(group):
            expected = 0
            for i_out, i_in, d in sorted(cps):
                # Rs_in is built from the Rs_outs, so every output is fully
                # covered by input slices (PyTorch's initial zeros never
                # survive).  Trace-time check only.
                assert i_out == expected, "Sortcut output must be fully covered"
                pieces.append((g * d_in + i_in, d))
                expected += d
            assert expected == dk
        merged = []
        for i0, d in pieces:
            if merged and merged[-1][0] + merged[-1][1] == i0:
                merged[-1] = (merged[-1][0], merged[-1][1] + d)
            else:
                merged.append((i0, d))
        plans.append(tuple(merged))
    return tuple(plans)


# ---------------------------------------------------------------------------
# Pallas kernel: one grid step copies a (tile_rows, G*d_in) slab of x into the
# per-output slabs by concatenating static lane slices (zero FLOPs).
# ---------------------------------------------------------------------------
def _sortcut_kernel(x_ref, *out_refs, piece_plans):
    x = x_ref[...]
    for out_ref, pieces in zip(out_refs, piece_plans):
        parts = [x[:, i0:i0 + d] for i0, d in pieces]
        out_ref[...] = parts[0] if len(parts) == 1 else jnp.concatenate(parts, axis=-1)


def _sublane(dtype):
    # minimum second-to-minor tile: 8 rows (f32) / 16 (bf16) / 32 (int8, fp8)
    return max(8, 32 // jnp.dtype(dtype).itemsize)


def _choose_group(n, d_in, sub):
    """Pick G: pack G logical rows per kernel row (free row-major reshape)."""
    target = max(1, _LANES // max(1, d_in))
    for g in range(target, 1, -1):
        if n % g == 0 and n // g >= sub:
            return g
    return 1


def _choose_tile_rows(n_rows, widths, itemsize, sub, vmem_block_budget):
    # VMEM cost of one (tile_rows, W) block: lane dim pads up to a multiple of 128.
    bytes_per_row = sum(_round_up(w, _LANES) for w in widths) * itemsize
    tile = (vmem_block_budget // (2 * bytes_per_row)) // sub * sub  # 2x double-buffer
    tile = max(sub, tile)
    if n_rows >= 2 * sub:
        # keep >= 2 grid steps so ("parallel",) can shard across v7x's 2 TCs
        tile = min(tile, _round_up(_cdiv(n_rows, 2), sub))
    tile = min(tile, _round_up(n_rows, sub))
    return tile


def sortcut_apply(x, Rs_outs, *, vmem_block_budget=16 << 20):
    """Apply Sortcut(*Rs_outs) to x[..., dim(Rs_in)] with a Pallas TPU kernel."""
    Rs_in, _, out_dims, copies = sortcut_plan(*Rs_outs)
    d_in = rs_dim(Rs_in)
    assert x.shape[-1] == d_in, (x.shape, d_in)

    lead = x.shape[:-1]
    n = math.prod(lead) if lead else 1
    itemsize = jnp.dtype(x.dtype).itemsize
    sub = _sublane(x.dtype)

    group = _choose_group(n, d_in, sub)
    n_rows = n // group
    x2 = x.reshape(n_rows, group * d_in)          # free row-major view, no copy

    widths = (group * d_in,) + tuple(group * dk for dk in out_dims)
    tile_rows = _choose_tile_rows(n_rows, widths, itemsize, sub, vmem_block_budget)
    piece_plans = _packed_piece_plans(copies, out_dims, d_in, group)

    grid = (_cdiv(n_rows, tile_rows),)            # no zero-pad: ragged tail handled
    outs = pl.pallas_call(
        partial(_sortcut_kernel, piece_plans=piece_plans),
        out_shape=tuple(
            jax.ShapeDtypeStruct((n_rows, group * dk), x.dtype) for dk in out_dims
        ),
        grid=grid,
        in_specs=[pl.BlockSpec((tile_rows, group * d_in), lambda i: (i, 0))],
        out_specs=tuple(
            pl.BlockSpec((tile_rows, group * dk), lambda i: (i, 0)) for dk in out_dims
        ),
        compiler_params=pltpu.CompilerParams(
            dimension_semantics=("parallel",),
            # raise v5e's 16 MiB default scoped VMEM; stays under v7x's 64 MiB
            # physical (32 MiB default scoped) with headroom for the compiler.
            vmem_limit_bytes=32 * 1024 * 1024,
        ),
        # zero FLOPs; exactly one HBM read of x and one HBM write of the outputs
        cost_estimate=pl.CostEstimate(
            flops=0, transcendentals=0, bytes_accessed=2 * n * d_in * itemsize
        ),
    )(x2)

    return tuple(o.reshape(lead + (dk,)) for o, dk in zip(outs, out_dims))


# ---------------------------------------------------------------------------
# Pure-JAX reference (literal transcription of the PyTorch forward loop)
# ---------------------------------------------------------------------------
def sortcut_ref(x, Rs_outs):
    _, _, out_dims, copies = sortcut_plan(*Rs_outs)
    outs = []
    for dk, cps in zip(out_dims, copies):
        out = jnp.zeros(x.shape[:-1] + (dk,), x.dtype)
        for i_out, i_in, d in cps:
            out = out.at[..., i_out:i_out + d].set(x[..., i_in:i_in + d])
        outs.append(out)
    return tuple(outs)


if __name__ == "__main__":
    # Example irreps: (mul, l, parity)
    Rs_out1 = [(2, 0, 1), (1, 1, 1)]               # dim = 2 + 3       = 5
    Rs_out2 = [(1, 0, 1), (2, 1, 1), (1, 2, 1)]    # dim = 1 + 6 + 5   = 12
    Rs_outs = (Rs_out1, Rs_out2)
    Rs_in, _, out_dims, _ = sortcut_plan(*Rs_outs)
    d_in = rs_dim(Rs_in)                           # = 17

    key = jax.random.PRNGKey(0)
    cases = [
        ((4, 16), jnp.float32),    # lane packing G=4, 2-step grid (megacore path)
        ((3, 7), jnp.float32),     # ragged rows: partial tail block, no padding
        ((4, 16), jnp.bfloat16),   # dtype-aware sublane tiling (16-row tiles)
    ]
    for idx, (lead, dtype) in enumerate(cases):
        k = jax.random.fold_in(key, idx)
        x = jax.random.normal(k, lead + (d_in,), dtype=dtype)
        outs = jax.block_until_ready(sortcut_apply(x, Rs_outs))
        refs = sortcut_ref(x, Rs_outs)
        for o, r, dk in zip(outs, refs, out_dims):
            assert o.shape == lead + (dk,), (o.shape, lead, dk)
            assert o.dtype == x.dtype
            assert jnp.array_equal(o, r), ("Pallas Sortcut mismatch", lead, dtype, dk)

    print("KERNEL_OK")
</pallas_src>

<mosaic_0001>
module attributes {stable_mosaic.version = 11 : i64} {
  func.func @_sortcut_kernel(%arg0: i32, %arg1: memref<8x68xf32, #tpu.memory_space<vmem>>, %arg2: memref<8x20xf32, #tpu.memory_space<vmem>>, %arg3: memref<8x48xf32, #tpu.memory_space<vmem>>) attributes {dimension_semantics = [#tpu.dimension_semantics<parallel>], iteration_bounds = array<i64: 2>, scalar_prefetch = 0 : i64, scratch_operands = 0 : i64, tpu.core_type = #tpu.core_type<tc>, window_params = [{transform_indices = @transform_0, window_bounds = array<i64: 8, 68>}, {transform_indices = @transform_1, window_bounds = array<i64: 8, 20>}, {transform_indices = @transform_2, window_bounds = array<i64: 8, 48>}]} {
    %c0 = arith.constant 0 : index
    %c0_0 = arith.constant 0 : index
    %0 = vector.load %arg1[%c0, %c0_0] : memref<8x68xf32, #tpu.memory_space<vmem>>, vector<8x68xf32>
    %1 = vector.extract_strided_slice %0 {offsets = [0, 0], sizes = [8, 2], strides = [1, 1]} : vector<8x68xf32> to vector<8x2xf32>
    %2 = vector.extract_strided_slice %0 {offsets = [0, 3], sizes = [8, 3], strides = [1, 1]} : vector<8x68xf32> to vector<8x3xf32>
    %3 = vector.extract_strided_slice %0 {offsets = [0, 17], sizes = [8, 2], strides = [1, 1]} : vector<8x68xf32> to vector<8x2xf32>
    %4 = vector.extract_strided_slice %0 {offsets = [0, 20], sizes = [8, 3], strides = [1, 1]} : vector<8x68xf32> to vector<8x3xf32>
    %5 = vector.extract_strided_slice %0 {offsets = [0, 34], sizes = [8, 2], strides = [1, 1]} : vector<8x68xf32> to vector<8x2xf32>
    %6 = vector.extract_strided_slice %0 {offsets = [0, 37], sizes = [8, 3], strides = [1, 1]} : vector<8x68xf32> to vector<8x3xf32>
    %7 = vector.extract_strided_slice %0 {offsets = [0, 51], sizes = [8, 2], strides = [1, 1]} : vector<8x68xf32> to vector<8x2xf32>
    %8 = vector.extract_strided_slice %0 {offsets = [0, 54], sizes = [8, 3], strides = [1, 1]} : vector<8x68xf32> to vector<8x3xf32>
    %9 = tpu.concatenate %1, %2, %3, %4, %5, %6, %7, %8 in 1 : vector<8x2xf32>, vector<8x3xf32>, vector<8x2xf32>, vector<8x3xf32>, vector<8x2xf32>, vector<8x3xf32>, vector<8x2xf32>, vector<8x3xf32> -> vector<8x20xf32>
    %c0_1 = arith.constant 0 : index
    %c0_2 = arith.constant 0 : index
    %10 = vector.load %arg2[%c0_1, %c0_2] : memref<8x20xf32, #tpu.memory_space<vmem>>, vector<8x20xf32>
    tpu.vector_store %arg2[%c0_1, %c0_2], %9 {strides = array<i32>} : memref<8x20xf32, #tpu.memory_space<vmem>>, vector<8x20xf32>,
    %11 = vector.extract_strided_slice %0 {offsets = [0, 2], sizes = [8, 1], strides = [1, 1]} : vector<8x68xf32> to vector<8x1xf32>
    %12 = vector.extract_strided_slice %0 {offsets = [0, 6], sizes = [8, 11], strides = [1, 1]} : vector<8x68xf32> to vector<8x11xf32>
    %13 = vector.extract_strided_slice %0 {offsets = [0, 19], sizes = [8, 1], strides = [1, 1]} : vector<8x68xf32> to vector<8x1xf32>
    %14 = vector.extract_strided_slice %0 {offsets = [0, 23], sizes = [8, 11], strides = [1, 1]} : vector<8x68xf32> to vector<8x11xf32>
    %15 = vector.extract_strided_slice %0 {offsets = [0, 36], sizes = [8, 1], strides = [1, 1]} : vector<8x68xf32> to vector<8x1xf32>
    %16 = vector.extract_strided_slice %0 {offsets = [0, 40], sizes = [8, 11], strides = [1, 1]} : vector<8x68xf32> to vector<8x11xf32>
    %17 = vector.extract_strided_slice %0 {offsets = [0, 53], sizes = [8, 1], strides = [1, 1]} : vector<8x68xf32> to vector<8x1xf32>
    %18 = vector.extract_strided_slice %0 {offsets = [0, 57], sizes = [8, 11], strides = [1, 1]} : vector<8x68xf32> to vector<8x11xf32>
    %19 = tpu.concatenate %11, %12, %13, %14, %15, %16, %17, %18 in 1 : vector<8x1xf32>, vector<8x11xf32>, vector<8x1xf32>, vector<8x11xf32>, vector<8x1xf32>, vector<8x11xf32>, vector<8x1xf32>, vector<8x11xf32> -> vector<8x48xf32>
    %c0_3 = arith.constant 0 : index
    %c0_4 = arith.constant 0 : index
    %20 = vector.load %arg3[%c0_3, %c0_4] : memref<8x48xf32, #tpu.memory_space<vmem>>, vector<8x48xf32>
    tpu.vector_store %arg3[%c0_3, %c0_4], %19 {strides = array<i32>} : memref<8x48xf32, #tpu.memory_space<vmem>>, vector<8x48xf32>,
    return
  }
  func.func @transform_0(%arg0: i32) -> (i32, i32) {
    %c0_i32 = arith.constant 0 : i32
    %c0_i32_0 = arith.constant 0 : i32
    return %arg0, %c0_i32 : i32, i32
  }
  func.func @transform_1(%arg0: i32) -> (i32, i32) {
    %c0_i32 = arith.constant 0 : i32
    %c0_i32_0 = arith.constant 0 : i32
    return %arg0, %c0_i32 : i32, i32
  }
  func.func @transform_2(%arg0: i32) -> (i32, i32) {
    %c0_i32 = arith.constant 0 : i32
    %c0_i32_0 = arith.constant 0 : i32
    return %arg0, %c0_i32 : i32, i32
  }
}

</mosaic_0001>

<bundles_post_ra>
// kernel: tpu_custom_call.1
= control target key start
LH: loop header
LB: loop body
LE: loop exit
PB: predicated region body
PF: predicated region fallthrough
CT: control target
= control target key end

     0   :  { %8 = vsyncpa [#allocation3], 0  ;;  %s818_s0 = inlined_call_operand.hbm [shape: f32[16,68], index: 0, kind: input, shape index: {}]   ;;  %s819_s1 = inlined_call_operand.hbm [shape: f32[16,20], index: 1, kind: output, shape index: {0}]   ;;  %s820_s2 = inlined_call_operand.hbm [shape: f32[16,48], index: 2, kind: output, shape index: {1}]  }
   0x1   :  { %10 = vsyncpa [#allocation3 + $0x1], 0 }
   0x2   :  { %11 = vsyncpa [#allocation4], 0 }
   0x3   :  { %13 = vsyncpa [#allocation4 + $0x1], 0 }
   0x4   :  { %14 = vsyncpa [#allocation7], 0 }
   0x5   :  { %16 = vsyncpa [#allocation7 + $0x1], 0  ;;  %s621_s9 = smov 0   ;;  %s623_s10 = smov 0  }
   0x6   :  { %s625_s11 = smov 0   ;;  %s627_s12 = smov 0  }
   0x7 LB: > { %s642_s13 = sadd.s32 4294967295, %s587_s12   ;;  %s379_s14 = sadd.s32 4294967294, %s587_s12   ;;  %s587_s12 = sphi %s627_s12, %s835_s12   ;;  %s583_s11 = sphi %s625_s11, %s834_s11   ;;  %s579_s10 = sphi %s623_s10, %s833_s10   ;;  %s575_s9 = sphi %s621_s9, %s832_s9  }
   0x8   : > { %s646_s15 = sadd.s32 1, %s587_s12   ;;  %s29_s16 = sadd.s32 1, %s583_s11 }
   0x9   : > { %s26_s17 = ssub.s32 %s587_s12, %s646_s15  ;;  %p36_p0 = scmp.ne.s32.totalorder %s583_s11, %s579_s10 }
   0xa   : > { %p27_p1 = scmp.eq.s32.totalorder %s26_s17, 0  ;;  %p37_p2 = scmp.eq.s32.totalorder %s587_s12, 0 }
   0xb   : > { %p42_p3 = scmp.ne.s32.totalorder %s579_s10, %s575_s9  ;;  %p43_p4 = scmp.eq.s32.totalorder %s642_s13, 0 }
   0xc   : > { %s658_s18 = scalar_select %p27_p1, %s583_s11, %s29_s16  }
   0xd   : > { %p660_p5 = por %p37_p2, %p36_p0  ;;  %p664_p6 = por %p43_p4, %p42_p3 }
   0xe   : > { %p66_p7 = scmp.eq.s32.totalorder %s642_s13, 1  ;;  %p72_p8 = scmp.eq.s32.totalorder %s379_s14, 1 }
   0xf   : > { %p411_p10 = scmp.lt.s32.totalorder %s587_s12, 2  ;;  %s118_s23 = sand.u32 1, %s583_s11  }
  0x10   : > { %p671_p11 = por %p66_p7, %p36_p0  ;;  %p675_p12 = por %p72_p8, %p42_p3 }
  0x11   : > { %s383_s24 = sshll.u32 %s587_s12, 7  ;;  %s382_s25 = sshll.u32 %s118_s23, 3 }
  0x12   : > { %s824_s21 = scalar_select %p671_p11, 1, 0 }
  0x13   : > { %s825_s22 = scalar_select %p675_p12, 1, 0 }
  0x14   : > { %s684_s28 = scalar_lea.hbm %s818_s0, %s383_s24  ;;  %s122_s29 = scalar_lea.vmem [#allocation2], %s382_s25 }
  0x15   : > { %s129_s30 = sshll.u32 %s122_s29, 4  ;;  %p688_p13 = pnand %p411_p10, %p660_p5  ;;  %s692_s30 = int_to_ptr.vmem [resolvable:$true] %s129_s30 }
  0x16   : > { %s119_s4 = scalar_lea.sflag [#allocation3], %s118_s23  ;;  %s459_s5 = scalar_lea.hbm %s684_s28, 128 }
  0x17   : > { %p460_p2 = scmp.ne.s32.totalorder %s684_s28, %s459_s5  ;;  %p461_p3 = pneg %p688_p13 }
  0x18   : > { %s464_s8 = scalar_lea.hbm %s818_s0, 256  ;;  %p465_p5 = scmp.lt.u32.totalorder %s684_s28, %s818_s0 }
  0x19   : > { %p462_p4 = pnand %p461_p3, %p460_p2  ;;  %p466_p8 = scmp.lt.u32.totalorder %s464_s8, %s459_s5 }
  0x1a   : > { %p468_p9 = scmp.lt.u32.totalorder %s459_s5, %s684_s28 }
  0x1b   : > { %p463_p7 = pneg %p462_p4  ;;  %p467_p10 = por %p466_p8, %p465_p5 }
  0x1d   : > { %p469_p0 = por %p468_p9, %p467_p10 }
  0x1f   : > { %p470_p1 = pnand %p469_p0, %p463_p7 }
  0x21   : > { %473 = shalt.err (!%p470_p1)
}
  0x22   : > { %s474_s17 = scalar_lea.vmem %s692_s30, 128  ;;  %s589_s19 = smov [#allocation2]  }
  0x23   : > { %p475_p2 = scmp.ne.s32.totalorder %s692_s30, %s474_s17  ;;  %s479_s23 = sshll.u32 %s589_s19, 4  ;;  %s480_s23 = int_to_ptr.vmem [resolvable:$false] %s479_s23 }
  0x24   : > { %s481_s24 = scalar_lea.vmem %s480_s23, 256  ;;  %p482_p11 = scmp.lt.s32.totalorder %s692_s30, %s480_s23 }
  0x25   : > { %p477_p4 = pnand %p475_p2, %p461_p3  ;;  %p483_p5 = scmp.lt.s32.totalorder %s481_s24, %s474_s17 }
  0x27   : > { %p478_p12 = pneg %p477_p4  ;;  %p484_p8 = por %p483_p5, %p482_p11 }
  0x29   : > { %p485_p9 = pnand %p484_p8, %p478_p12 }
  0x2b   : > { %488 = shalt.err (!%p485_p9)
}
  0x2c   : > { %403 = dma.hbm_to_vmem [thread:$0]  (!%p688_p13), %s684_s28, 128, %s692_s30, %s119_s4  }
  0x2d   : > { %p827_p0 = scmp.lt.s32.totalorder %s587_s12, 3  ;;  %p828_p1 = scmp.ge.s32.totalorder %s587_s12, 1 }
  0x2f   : > { %p135_p3 = pnand %p828_p1, %p827_p0 }
  0x30   : > { %s726_s25 = sand.u32 (!%p135_p3), 1, %s579_s10  }
  0x31   : > { %138 = sbr.rel (%p135_p3) target bundleno = 236 (0xec), region = 24  ;;  %s729_s26 = sshll.u32 (!%p135_p3), %s726_s25, 3 }
  0x32   : > { %s141_s27 = scalar_lea.sflag (!%p135_p3), [#allocation3], %s726_s25  ;;  %s144_s29 = scalar_lea.vmem (!%p135_p3), [#allocation2], %s729_s26 }
  0x38   : > { %562 = dma.done.wait (%p664_p6), %s141_s27, 128  }
  0x39   : > { %564 = vsyncadd (%p664_p6), %s141_s27, 4294967168  ;;  %v170_v0 = vld [vmem:[%s144_s29] sm:$0xff]  ;;  %s590_s28 = smov 123   ;;  %s591_s30 = smov 127   ;;  %vm230_vm0 = vcmask 7168   ;;  %vm201_vm1 = vcmask 97280  }
  0x3a   : > { %212 = vrot.lane.b32.xlu1 %v170_v0, %s590_s28  ;;  %172 = vrot.lane.b32.xlu0 %v170_v0, %s591_s30  ;;  %s592_s3 = smov 116   ;;  %s593_s4 = smov 126   ;;  %vm193_vm2 = vcmask 15360   ;;  %vm233_vm3 = vcmask 105472   ;;  %vm195_vm4 = vcmask 39936   ;;  %vm197_vm5 = vcmask 56320  }
  0x3b   : > { %s594_s5 = smov 115   ;;  %s595_s6 = smov 121   ;;  %vm199_vm6 = vcmask 80896   ;;  %vm235_vm7 = vcmask 195584   ;;  %vm237_vm8 = vcmask 203776   ;;  %vm239_vm9 = vcmask 293888  }
  0x3c   : > { %s596_s7 = smov 104   ;;  %s597_s8 = smov 118   ;;  %vm203_vm10 = vcmask 121856   ;;  %vm241_vm11 = vcmask 302080   ;;  %vm205_vm12 = vcmask 138240   ;;  %vm207_vm13 = vcmask 162816  }
  0x3d   : > { %s598_s14 = smov 113   ;;  %s599_s20 = smov 103   ;;  %vm243_vm14 = vcmask 392192  }
  0x3e   : > { %175 = vrot.lane.b32.xlu1 %v170_v0, %s592_s3  ;;  %209 = vrot.lane.b32.xlu0 %v170_v0, %s593_s4  ;;  %s600_s16 = smov 111   ;;  %s601_s17 = smov 92  }
  0x3f   : > { %s602_s19 = smov 108   ;;  %s603_s23 = smov 91  }
  0x40   : > { %s390_s24 = sshll.u32 %s642_s13, 7  ;;  %s162_s27 = scalar_lea.vmem [#allocation5], %s729_s26 }
  0x41   : > { %s264_s29 = sshll.u32 %s162_s27, 4  ;;  %s169_s28 = scalar_lea.vmem [#allocation6], %s729_s26  ;;  %s747_s29 = int_to_ptr.vmem [resolvable:$true] %s264_s29 }
  0x42   : > { %178 = vrot.lane.b32.xlu1 %v170_v0, %s594_s5  ;;  %215 = vrot.lane.b32.xlu0 %v170_v0, %s595_s6  ;;  %s277_s30 = sshll.u32 %s169_s28, 4  ;;  %s745_s13 = scalar_lea.hbm %s819_s1, %s390_s24  ;;  %s754_s30 = int_to_ptr.vmem [resolvable:$true] %s277_s30 }
  0x43   : > { %s752_s6 = scalar_lea.hbm %s820_s2, %s390_s24  ;;  %p829_p11 = scmp.ne.s32.totalorder %s824_s21, 0 }
  0x46   : > { %181 = vrot.lane.b32.xlu1 %v170_v0, %s596_s7  ;;  %218 = vrot.lane.b32.xlu0 %v170_v0, %s597_s8  ;;  %s246_s7 = scalar_lea.sflag [#allocation4], %s726_s25  ;;  %s489_s8 = scalar_lea.vmem %s747_s29, 128 }
  0x47   : > { %p490_p6 = scmp.ne.s32.totalorder %s747_s29, %s489_s8 }
  0x49   : > { %p491_p12 = pnand %p490_p6, %p829_p11 }
  0x4a   : > { %221 = vrot.lane.b32.xlu1 %v170_v0, %s598_s14  ;;  %184 = vrot.lane.b32.xlu0 %v170_v0, %s599_s20  ;;  %s604_s14 = smov [#allocation5]  }
  0x4b   : > { %p492_p13 = pneg %p491_p12  ;;  %s493_s20 = sshll.u32 %s604_s14, 4  ;;  %s494_s20 = int_to_ptr.vmem [resolvable:$false] %s493_s20 }
  0x4c   : > { %p496_p7 = scmp.lt.s32.totalorder %s747_s29, %s494_s20 }
  0x4e   : > { %224 = vrot.lane.b32.xlu1 %v170_v0, %s600_s16  ;;  %187 = vrot.lane.b32.xlu0 %v170_v0, %s601_s17  ;;  %s495_s16 = scalar_lea.vmem %s494_s20, 256 }
  0x4f   : > { %p497_p10 = scmp.lt.s32.totalorder %s495_s16, %s489_s8 }
  0x51   : > { %p498_p2 = por %p497_p10, %p496_p7 }
  0x52   : > { %227 = vrot.lane.b32.xlu1 %v170_v0, %s602_s19  ;;  %190 = vrot.lane.b32.xlu0 %v170_v0, %s603_s23 }
  0x53   : > { %p499_p4 = pnand %p498_p2, %p492_p13 }
  0xac   : > { %v213_v1 = vpop.permute.xlu1 %212  ;;  %v173_v2 = vpop.permute.xlu0 %172 }
  0xad   : > { %v194_v13 = vsel %vm193_vm2, %v170_v0, %v173_v2 }
  0xb0   : > { %v176_v3 = vpop.permute.xlu1 %175  ;;  %v210_v4 = vpop.permute.xlu0 %209 }
  0xb1   : > { %v231_v11 = vsel %vm230_vm0, %v210_v4, %v213_v1  ;;  %v196_v15 = vsel %vm195_vm4, %v194_v13, %v176_v3 }
  0xb4   : > { %v179_v5 = vpop.permute.xlu1 %178  ;;  %v216_v6 = vpop.permute.xlu0 %215 }
  0xb5   : > { %v232_v12 = vsel %vm201_vm1, %v231_v11, %v216_v6  ;;  %v198_v18 = vsel %vm197_vm5, %v196_v15, %v179_v5 }
  0xb8   : > { %v182_v7 = vpop.permute.xlu1 %181  ;;  %v219_v8 = vpop.permute.xlu0 %218 }
  0xb9   : > { %v234_v14 = vsel %vm233_vm3, %v232_v12, %v219_v8  ;;  %v200_v19 = vsel %vm199_vm6, %v198_v18, %v182_v7 }
  0xba   : > { %v236_v20 = vsel %vm235_vm7, %v234_v14, %v176_v3 }
  0xbc   : > { %v222_v9 = vpop.permute.xlu1 %221  ;;  %v185_v10 = vpop.permute.xlu0 %184 }
  0xbd   : > { %v238_v21 = vsel %vm237_vm8, %v236_v20, %v222_v9  ;;  %v202_v22 = vsel %vm201_vm1, %v200_v19, %v185_v10 }
  0xc0   : > { %v225_v16 = vpop.permute.xlu1 %224  ;;  %v188_v17 = vpop.permute.xlu0 %187 }
  0xc1   : > { %v240_v23 = vsel %vm239_vm9, %v238_v21, %v225_v16  ;;  %v204_v24 = vsel %vm203_vm10, %v202_v22, %v188_v17 }
  0xc4   : > { %v228_v25 = vpop.permute.xlu1 %227  ;;  %v191_v26 = vpop.permute.xlu0 %190 }
  0xc5   : > { %v242_v27 = vsel %vm241_vm11, %v240_v23, %v228_v25  ;;  %v206_v28 = vsel %vm205_vm12, %v204_v24, %v191_v26 }
  0xc6   : > { %208 = vst.msk [vmem:[%s162_s27] sm:$0xff] %vm207_vm13, %v206_v28 }
  0xc7   : > { %244 = vst.msk [vmem:[%s169_s28] sm:$0xff] %vm243_vm14, %v242_v27 }
  0xc8   : > { %502 = shalt.err (!%p499_p4)
}
  0xc9   : > { %s503_s17 = scalar_lea.hbm %s745_s13, 128  ;;  %s507_s24 = scalar_lea.hbm %s819_s1, 256 }
  0xca   : > { %p504_p5 = scmp.ne.s32.totalorder %s745_s13, %s503_s17  ;;  %p508_p0 = scmp.lt.u32.totalorder %s745_s13, %s819_s1 }
  0xcb   : > { %p509_p1 = scmp.lt.u32.totalorder %s507_s24, %s503_s17  ;;  %p511_p6 = scmp.lt.u32.totalorder %s503_s17, %s745_s13 }
  0xcc   : > { %p505_p8 = pnand %p504_p5, %p829_p11 }
  0xcd   : > { %p510_p3 = por %p509_p1, %p508_p0 }
  0xce   : > { %p506_p9 = pneg %p505_p8 }
  0xcf   : > { %p512_p12 = por %p511_p6, %p510_p3 }
  0xd1   : > { %p513_p13 = pnand %p512_p12, %p506_p9 }
  0xd3   : > { %516 = shalt.err (!%p513_p13)
}
  0xd4   : > { %396 = dma.vmem_to_hbm [thread:$0]  (%p829_p11), %s747_s29, 128, %s745_s13, %s246_s7  }
  0xd5   : > { %s251_s3 = scalar_lea.sflag [#allocation7], %s726_s25  ;;  %s517_s4 = scalar_lea.vmem %s754_s30, 128 }
  0xd6   : > { %p518_p7 = scmp.ne.s32.totalorder %s754_s30, %s517_s4  ;;  %s605_s26 = smov [#allocation6]  }
  0xd7   : > { %s521_s5 = sshll.u32 %s605_s26, 4  ;;  %s522_s5 = int_to_ptr.vmem [resolvable:$false] %s521_s5 }
  0xd8   : > { %p519_p10 = pnand %p518_p7, %p829_p11  ;;  %s523_s8 = scalar_lea.vmem %s522_s5, 256 }
  0xd9   : > { %p524_p4 = scmp.lt.s32.totalorder %s754_s30, %s522_s5  ;;  %p525_p5 = scmp.lt.s32.totalorder %s523_s8, %s517_s4 }
  0xda   : > { %p520_p2 = pneg %p519_p10 }
  0xdb   : > { %p526_p8 = por %p525_p5, %p524_p4 }
  0xdd   : > { %p527_p9 = pnand %p526_p8, %p520_p2 }
  0xdf   : > { %530 = shalt.err (!%p527_p9)
}
  0xe0   : > { %s531_s25 = scalar_lea.hbm %s752_s6, 128  ;;  %s535_s7 = scalar_lea.hbm %s820_s2, 256 }
  0xe1   : > { %p532_p0 = scmp.ne.s32.totalorder %s752_s6, %s531_s25  ;;  %p536_p6 = scmp.lt.u32.totalorder %s752_s6, %s820_s2 }
  0xe2   : > { %p537_p12 = scmp.lt.u32.totalorder %s535_s7, %s531_s25  ;;  %p539_p7 = scmp.lt.u32.totalorder %s531_s25, %s752_s6 }
  0xe3   : > { %p533_p1 = pnand %p532_p0, %p829_p11 }
  0xe4   : > { %p538_p13 = por %p537_p12, %p536_p6 }
  0xe5   : > { %p534_p3 = pneg %p533_p1 }
  0xe6   : > { %p540_p10 = por %p539_p7, %p538_p13 }
  0xe8   : > { %p541_p2 = pnand %p540_p10, %p534_p3 }
  0xea   : > { %544 = shalt.err (!%p541_p2)
}
  0xeb   : > { %397 = dma.vmem_to_hbm [thread:$0]  (%p829_p11), %s754_s30, 128, %s752_s6, %s251_s3  }
  0xec PF: > { %s289_s16 = sand.u32 1, %s575_s9   ;;  %p830_p4 = scmp.ne.s32.totalorder %s825_s22, 0 }
  0xed   : > { %p831_p5 = scmp.ge.s32.totalorder %s587_s12, 2  ;;  %s290_s17 = scalar_lea.sflag [#allocation4], %s289_s16 }
  0xef   : > { %p405_p8 = pnand %p831_p5, %p830_p4 }
  0xf1   : > { %566 = dma.done.wait (!%p405_p8), %s290_s17, 128  }
  0xf2   : > { %568 = vsyncadd (!%p405_p8), %s290_s17, 4294967168  ;;  %s299_s19 = scalar_lea.sflag [#allocation7], %s289_s16 }
  0xf3   : > { %570 = dma.done.wait (!%p405_p8), %s299_s19, 128  }
  0xf4   : > { %572 = vsyncadd (!%p405_p8), %s299_s19, 4294967168  ;;  %p19_p11 = scmp.ge.s32.totalorder %s646_s15, 4   ;;  %s832_s9 = smov %s579_s10 }
  0xf5   : > { %s833_s10 = smov %s583_s11  ;;  %s834_s11 = smov %s658_s18 }
  0xf6   : > { %s835_s12 = smov %s646_s15  ;;  %21 = sbr.rel (!%p19_p11) target bundleno = 7 (0x7), region = 86 }
  0xfd   :  { %304 = vsyncpa [#allocation3], 1 }
  0xfe   :  { %306 = vsyncpa [#allocation3 + $0x1], 1 }
  0xff   :  { %307 = vsyncpa [#allocation4], 1 }
 0x100   :  { %309 = vsyncpa [#allocation4 + $0x1], 1 }
 0x101   :  { %310 = vsyncpa [#allocation7], 1 }
 0x102   :  { %312 = vsyncpa [#allocation7 + $0x1], 1 }

</bundles_post_ra>
